<compile_context>
chip_gen: v6e
topology: v6e:2x2x1
jax: 0.10.0
libtpu: 0.0.40
codegen_flags: <defaults>
</compile_context>

<pallas_src>
import numpy as np
import jax
import jax.numpy as jnp
from jax import lax
from jax.experimental import pallas as pl
from jax.experimental.pallas import tpu as pltpu

_LANE = 128
_SUBLANE = 8


def _round_up(x: int, m: int) -> int:
    return ((x + m - 1) // m) * m


def _per_row_vmem_bytes(n_classes: int, logits_itemsize: int) -> int:
    """Approximate VMEM bytes per batch row (lane padding included)."""
    pad_c = _round_up(n_classes, _LANE)
    return (2 * pad_c * max(int(logits_itemsize), 2)   # logits blocks, double-buffered
            + 2 * _LANE * 4                            # (tb,1) int32 target blocks, double-buffered
            + _LANE * 4                                # (tb,1) f32 accumulator scratch
            + 4 * pad_c * 4                            # f32 temporaries: x, e, onehot, m_rows
            + 3 * _LANE * 4)                           # f32 temporaries: num, den, per_sample


def _derive_tile_b(n_classes: int, logits_itemsize: int, budget_bytes: int) -> int:
    pad_c = _round_up(n_classes, _LANE)
    m_bytes = _round_up(n_classes, _SUBLANE) * pad_c * 4
    per_row = _per_row_vmem_bytes(n_classes, logits_itemsize)
    tb = (budget_bytes - m_bytes) // per_row
    tb = max(8, min(int(tb), 16384))
    return (tb // 8) * 8


def _make_kernel(batch_size: int, tile_b: int, tiles_per_core: int):
    def kernel(logits_ref, tgt_ref, m_ref, out_ref, acc_ref):
        c = pl.program_id(0)            # batch shard ("parallel" -> one per TensorCore)
        i = pl.program_id(1)            # tile within shard ("arbitrary" reduction axis)
        blk = c * tiles_per_core + i    # logical (unclamped) batch-tile index

        @pl.when(i == 0)
        def _init():
            acc_ref[...] = jnp.zeros_like(acc_ref)

        # Numerically-stable softmax pieces; normalization fused into one divide.
        x = logits_ref[...].astype(jnp.float32)                   # (TB, C)
        x_max = jnp.max(x, axis=-1, keepdims=True)
        e = jnp.exp(x - x_max)                                     # (TB, C)
        den = jnp.sum(e, axis=-1, keepdims=True)                   # (TB, 1)

        # Gather M[target, :] in-kernel (no HBM one-hot stream): iota-compare
        # one-hot contracted against the VMEM-resident (C, C) cost matrix.
        tgt = tgt_ref[...]                                         # (TB, 1) int32
        cls = lax.broadcasted_iota(jnp.int32, x.shape, 1)          # (TB, C)
        onehot = (cls == tgt).astype(jnp.float32)                  # (TB, C)
        m_rows = jnp.dot(onehot, m_ref[...],
                         preferred_element_type=jnp.float32)       # (TB, C)

        num = jnp.sum(m_rows * e, axis=-1, keepdims=True)          # (TB, 1)
        per_sample = num / den                                     # exact divide (tolerance)

        is_full = (blk + 1) * tile_b <= batch_size

        @pl.when(is_full)
        def _acc_full():                                           # steady-state path
            acc_ref[...] += per_sample

        @pl.when(jnp.logical_not(is_full))
        def _acc_masked():                                         # partial / clamped tile
            row = lax.broadcasted_iota(jnp.int32, per_sample.shape, 0) + blk * tile_b
            # Keep the select (not a multiply): padded rows may hold NaN/inf garbage.
            acc_ref[...] += jnp.where(row < batch_size, per_sample, 0.0)

        @pl.when(i == pl.num_programs(1) - 1)
        def _finalize():
            total = jnp.sum(acc_ref[...], axis=(0, 1), keepdims=True)   # (1, 1)
            out_ref[...] = jnp.broadcast_to(total, out_ref.shape)       # lane-dense store

    return kernel


def make_cost_matrix(n_classes: int, exp: float = 1.0) -> jnp.ndarray:
    # Same construction as the PyTorch __init__.
    x = np.abs(np.arange(n_classes, dtype=np.float32))
    M = np.abs(x[:, np.newaxis] - x[np.newaxis, :]) ** exp
    M /= M.max()
    return jnp.asarray(M, dtype=jnp.float32)


def cost_sensitive_loss(logits: jnp.ndarray,
                        target: jnp.ndarray,
                        M: jnp.ndarray,
                        *,
                        tile_b: int | None = None,
                        num_cores: int = 2,
                        vmem_budget_bytes: int = 24 << 20) -> jnp.ndarray:
    """logits: (B, C) any float dtype, target: (B,) int, M: (C, C) -> scalar mean loss."""
    if logits.shape[0] != target.shape[0]:
        raise ValueError(
            "Expected input batch_size ({}) to match target batch_size ({}).".format(
                logits.shape[0], target.shape[0]))
    B, C = logits.shape
    nc = max(1, int(num_cores))
    itemsize = jnp.dtype(logits.dtype).itemsize

    if tile_b is None:
        tb = _derive_tile_b(C, itemsize, vmem_budget_bytes)
    else:
        tb = _round_up(max(int(tile_b), 8), 8)
    tb = max(8, min(tb, _round_up(pl.cdiv(B, nc), 8)))   # no tile larger than a core's share

    nt = pl.cdiv(B, tb)          # logical batch tiles
    tpc = pl.cdiv(nt, nc)        # tiles per core-shard

    # Clamp the block index so shards whose last tiles run past nt never read
    # out of bounds; the logical-row mask zeroes their contribution.
    def batch_map(c, i):
        return (jnp.minimum(c * tpc + i, nt - 1), 0)

    pad_c = _round_up(C, _LANE)
    m_bytes = _round_up(C, _SUBLANE) * pad_c * 4
    est = tb * _per_row_vmem_bytes(C, itemsize) + m_bytes + nc * _SUBLANE * _LANE * 4
    # >= 32 MiB (fine everywhere), capped at 48 MiB (safe on v7x's 64 MiB VMEM).
    vmem_limit = int(min(max(32 << 20, est + (8 << 20)), 48 << 20))

    out = pl.pallas_call(
        _make_kernel(B, tb, tpc),
        out_shape=jax.ShapeDtypeStruct((nc * _SUBLANE, _LANE), jnp.float32),
        grid_spec=pltpu.PrefetchScalarGridSpec(
            num_scalar_prefetch=0,
            grid=(nc, tpc),
            in_specs=[
                pl.BlockSpec((tb, C), batch_map),            # logits tile (pipelined, native dtype)
                pl.BlockSpec((tb, 1), batch_map),            # int32 targets tile (pipelined)
                pl.BlockSpec((C, C), lambda c, i: (0, 0)),   # cost matrix (resident)
            ],
            out_specs=pl.BlockSpec((_SUBLANE, _LANE), lambda c, i: (c, 0)),  # per-core partial
            scratch_shapes=[pltpu.VMEM((tb, 1), jnp.float32)],               # persistent accumulator
        ),
        compiler_params=pltpu.CompilerParams(
            dimension_semantics=("parallel", "arbitrary"),
            vmem_limit_bytes=vmem_limit,
        ),
    )(logits,                                           # native dtype: no wrapper f32 cast
      target.astype(jnp.int32).reshape(B, 1),
      M.astype(jnp.float32))

    partials = out[::_SUBLANE, 0]                       # (nc,) per-core partial sums
    return jnp.sum(partials) / jnp.float32(B)           # 'mean' reduction


def _reference(logits, target, M):
    # Pure-JAX reference mirroring the PyTorch forward (softmax + 'mean').
    preds = jax.nn.softmax(logits.astype(jnp.float32), axis=1)
    loss = jnp.sum(M[target, :] * preds, axis=-1)
    return jnp.mean(loss)


if __name__ == "__main__":
    n_classes = 8
    M = make_cost_matrix(n_classes, exp=1.0)
    key = jax.random.PRNGKey(0)
    k_logits, k_target = jax.random.split(key)

    # (batch, explicit tile_b or None, dtype) — exercises multi-step accumulation,
    # partial last tile, clamped fully-out-of-range tile, VMEM-derived tile and
    # native-bf16 streaming.
    cases = [
        (200, 64, jnp.float32),
        (150, 64, jnp.float32),
        (200, None, jnp.float32),
        (200, 64, jnp.bfloat16),
    ]

    for batch, tb, dt in cases:
        logits = jax.random.normal(k_logits, (batch, n_classes), dtype=jnp.float32).astype(dt)
        target = jax.random.randint(k_target, (batch,), 0, n_classes, dtype=jnp.int32)

        out = cost_sensitive_loss(logits, target, M, tile_b=tb)
        out = jax.block_until_ready(out)
        ref = jax.block_until_ready(_reference(logits, target, M))

        assert np.allclose(np.asarray(out), np.asarray(ref), rtol=1e-5, atol=1e-6), (
            f"mismatch (batch={batch}, tile_b={tb}, dtype={dt}): kernel={out} ref={ref}")

    print("KERNEL_OK")
</pallas_src>

<mosaic_0001>
module attributes {stable_mosaic.version = 11 : i64} {
  func.func @kernel(%arg0: i32, %arg1: i32, %arg2: memref<64x8xf32, #tpu.memory_space<vmem>>, %arg3: memref<64x1xi32, #tpu.memory_space<vmem>>, %arg4: memref<8x8xf32, #tpu.memory_space<vmem>>, %arg5: memref<8x128xf32, #tpu.memory_space<vmem>>, %arg6: memref<64x1xf32, #tpu.memory_space<vmem>>) attributes {dimension_semantics = [#tpu.dimension_semantics<parallel>, #tpu.dimension_semantics<arbitrary>], iteration_bounds = array<i64: 2, 2>, scalar_prefetch = 0 : i64, scratch_operands = 1 : i64, tpu.core_type = #tpu.core_type<tc>, window_params = [{transform_indices = @transform_0, window_bounds = array<i64: 64, 8>}, {transform_indices = @transform_1, window_bounds = array<i64: 64, 1>}, {pipeline_mode = #tpu.pipeline_mode<synchronous>, transform_indices = @transform_2, window_bounds = array<i64: 8, 8>}, {transform_indices = @transform_3, window_bounds = array<i64: 8, 128>}]} {
    %c2_i32 = arith.constant 2 : i32
    %0 = arith.muli %arg0, %c2_i32 : i32
    %1 = arith.addi %0, %arg1 : i32
    %c0_i32 = arith.constant 0 : i32
    %2 = arith.cmpi eq, %arg1, %c0_i32 : i32
    %3 = arith.extui %2 : i1 to i32
    %c0_i32_0 = arith.constant 0 : i32
    %4 = arith.cmpi ne, %3, %c0_i32_0 : i32
    scf.if %4 {
      %cst_13 = arith.constant 0.000000e+00 : f32
      %36 = vector.broadcast %cst_13 : f32 to vector<64x1xf32>
      %c0_14 = arith.constant 0 : index
      %c0_15 = arith.constant 0 : index
      %37 = vector.load %arg6[%c0_14, %c0_15] : memref<64x1xf32, #tpu.memory_space<vmem>>, vector<64x1xf32>
      tpu.vector_store %arg6[%c0_14, %c0_15], %36 {strides = array<i32>} : memref<64x1xf32, #tpu.memory_space<vmem>>, vector<64x1xf32>,
    } else {
    }
    %c0 = arith.constant 0 : index
    %c0_1 = arith.constant 0 : index
    %5 = vector.load %arg2[%c0, %c0_1] : memref<64x8xf32, #tpu.memory_space<vmem>>, vector<64x8xf32>
    %cst = arith.constant dense<0xFF800000> : vector<64xf32>
    %6 = vector.multi_reduction <maximumf>, %5, %cst [1] : vector<64x8xf32> to vector<64xf32>
    %7 = vector.shape_cast %6 : vector<64xf32> to vector<64x1xf32>
    %8 = vector.broadcast %7 : vector<64x1xf32> to vector<64x8xf32>
    %9 = arith.subf %5, %8 : vector<64x8xf32>
    %10 = math.exp %9 : vector<64x8xf32>
    %cst_2 = arith.constant dense<0.000000e+00> : vector<64xf32>
    %11 = vector.multi_reduction <add>, %10, %cst_2 [1] : vector<64x8xf32> to vector<64xf32>
    %12 = vector.shape_cast %11 : vector<64xf32> to vector<64x1xf32>
    %c0_3 = arith.constant 0 : index
    %c0_4 = arith.constant 0 : index
    %13 = vector.load %arg3[%c0_3, %c0_4] : memref<64x1xi32, #tpu.memory_space<vmem>>, vector<64x1xi32>
    %14 = tpu.iota {dimensions = array<i32: 1>} : vector<64x8xi32>
    %15 = vector.broadcast %13 : vector<64x1xi32> to vector<64x8xi32>
    %16 = arith.cmpi eq, %14, %15 : vector<64x8xi32>
    %17 = arith.extui %16 : vector<64x8xi1> to vector<64x8xi32>
    %18 = arith.sitofp %17 : vector<64x8xi32> to vector<64x8xf32>
    %c0_5 = arith.constant 0 : index
    %c0_6 = arith.constant 0 : index
    %19 = vector.load %arg4[%c0_5, %c0_6] : memref<8x8xf32, #tpu.memory_space<vmem>>, vector<8x8xf32>
    %cst_7 = arith.constant dense<0.000000e+00> : vector<64x8xf32>
    %20 = tpu.matmul %18, %19, %cst_7 {dimension_numbers = #tpu.dot_dimension_numbers<[1], [0], [0], [1], [0, 0, 1, 1], [], []>} : vector<64x8xf32>, vector<8x8xf32>, vector<64x8xf32> -> vector<64x8xf32>
    %21 = arith.mulf %20, %10 : vector<64x8xf32>
    %cst_8 = arith.constant dense<0.000000e+00> : vector<64xf32>
    %22 = vector.multi_reduction <add>, %21, %cst_8 [1] : vector<64x8xf32> to vector<64xf32>
    %23 = vector.shape_cast %22 : vector<64xf32> to vector<64x1xf32>
    %24 = arith.divf %23, %12 : vector<64x1xf32>
    %c1_i32 = arith.constant 1 : i32
    %25 = arith.addi %1, %c1_i32 : i32
    %c64_i32 = arith.constant 64 : i32
    %26 = arith.muli %25, %c64_i32 : i32
    %c200_i32 = arith.constant 200 : i32
    %27 = arith.cmpi sle, %26, %c200_i32 : i32
    %28 = arith.extui %27 : i1 to i32
    %c0_i32_9 = arith.constant 0 : i32
    %29 = arith.cmpi ne, %28, %c0_i32_9 : i32
    scf.if %29 {
      %c0_13 = arith.constant 0 : index
      %c0_14 = arith.constant 0 : index
      %36 = vector.load %arg6[%c0_13, %c0_14] : memref<64x1xf32, #tpu.memory_space<vmem>>, vector<64x1xf32>
      %37 = arith.addf %36, %24 : vector<64x1xf32>
      %c0_15 = arith.constant 0 : index
      %c0_16 = arith.constant 0 : index
      %38 = vector.load %arg6[%c0_15, %c0_16] : memref<64x1xf32, #tpu.memory_space<vmem>>, vector<64x1xf32>
      tpu.vector_store %arg6[%c0_15, %c0_16], %37 {strides = array<i32>} : memref<64x1xf32, #tpu.memory_space<vmem>>, vector<64x1xf32>,
    } else {
    }
    %true = arith.constant true
    %30 = arith.xori %27, %true : i1
    %31 = arith.extui %30 : i1 to i32
    %c0_i32_10 = arith.constant 0 : i32
    %32 = arith.cmpi ne, %31, %c0_i32_10 : i32
    scf.if %32 {
      %36 = tpu.iota {dimensions = array<i32: 0>} : vector<64x1xi32>
      %c64_i32_13 = arith.constant 64 : i32
      %37 = arith.muli %1, %c64_i32_13 : i32
      %38 = vector.broadcast %37 : i32 to vector<64x1xi32>
      %39 = arith.addi %36, %38 : vector<64x1xi32>
      %c0_14 = arith.constant 0 : index
      %c0_15 = arith.constant 0 : index
      %40 = vector.load %arg6[%c0_14, %c0_15] : memref<64x1xf32, #tpu.memory_space<vmem>>, vector<64x1xf32>
      %c200_i32_16 = arith.constant 200 : i32
      %41 = vector.broadcast %c200_i32_16 : i32 to vector<64x1xi32>
      %42 = arith.cmpi slt, %39, %41 : vector<64x1xi32>
      %cst_17 = arith.constant 0.000000e+00 : f32
      %43 = vector.broadcast %cst_17 : f32 to vector<64x1xf32>
      %44 = arith.select %42, %24, %43 : vector<64x1xi1>, vector<64x1xf32>
      %45 = arith.addf %40, %44 : vector<64x1xf32>
      %c0_18 = arith.constant 0 : index
      %c0_19 = arith.constant 0 : index
      %46 = vector.load %arg6[%c0_18, %c0_19] : memref<64x1xf32, #tpu.memory_space<vmem>>, vector<64x1xf32>
      tpu.vector_store %arg6[%c0_18, %c0_19], %45 {strides = array<i32>} : memref<64x1xf32, #tpu.memory_space<vmem>>, vector<64x1xf32>,
    } else {
    }
    %c1_i32_11 = arith.constant 1 : i32
    %33 = arith.cmpi eq, %arg1, %c1_i32_11 : i32
    %34 = arith.extui %33 : i1 to i32
    %c0_i32_12 = arith.constant 0 : i32
    %35 = arith.cmpi ne, %34, %c0_i32_12 : i32
    scf.if %35 {
      %c0_13 = arith.constant 0 : index
      %c0_14 = arith.constant 0 : index
      %36 = vector.load %arg6[%c0_13, %c0_14] : memref<64x1xf32, #tpu.memory_space<vmem>>, vector<64x1xf32>
      %37 = vector.shape_cast %36 : vector<64x1xf32> to vector<1x64x1xf32>
      %cst_15 = arith.constant dense<0.000000e+00> : vector<1xf32>
      %38 = vector.multi_reduction <add>, %37, %cst_15 [1, 2] : vector<1x64x1xf32> to vector<1xf32>
      %39 = vector.shape_cast %38 : vector<1xf32> to vector<1x1x1xf32>
      %40 = vector.extract %39[0, 0, 0] : f32 from vector<1x1x1xf32>
      %41 = vector.broadcast %40 : f32 to vector<1x1xf32>
      %42 = vector.shape_cast %41 : vector<1x1xf32> to vector<1x1xf32>
      %43 = vector.broadcast %42 : vector<1x1xf32> to vector<8x128xf32>
      %c0_16 = arith.constant 0 : index
      %c0_17 = arith.constant 0 : index
      %44 = vector.load %arg5[%c0_16, %c0_17] : memref<8x128xf32, #tpu.memory_space<vmem>>, vector<8x128xf32>
      tpu.vector_store %arg5[%c0_16, %c0_17], %43 {strides = array<i32>} : memref<8x128xf32, #tpu.memory_space<vmem>>, vector<8x128xf32>,
    } else {
    }
    return
  }
  func.func @transform_0(%arg0: i32, %arg1: i32) -> (i32, i32) {
    %c2_i32 = arith.constant 2 : i32
    %0 = arith.muli %arg0, %c2_i32 : i32
    %1 = arith.addi %0, %arg1 : i32
    %c3_i32 = arith.constant 3 : i32
    %2 = arith.minsi %1, %c3_i32 : i32
    %c0_i32 = arith.constant 0 : i32
    %c0_i32_0 = arith.constant 0 : i32
    return %2, %c0_i32 : i32, i32
  }
  func.func @transform_1(%arg0: i32, %arg1: i32) -> (i32, i32) {
    %c2_i32 = arith.constant 2 : i32
    %0 = arith.muli %arg0, %c2_i32 : i32
    %1 = arith.addi %0, %arg1 : i32
    %c3_i32 = arith.constant 3 : i32
    %2 = arith.minsi %1, %c3_i32 : i32
    %c0_i32 = arith.constant 0 : i32
    %c0_i32_0 = arith.constant 0 : i32
    return %2, %c0_i32 : i32, i32
  }
  func.func @transform_2(%arg0: i32, %arg1: i32) -> (i32, i32) {
    %c0_i32 = arith.constant 0 : i32
    %c0_i32_0 = arith.constant 0 : i32
    %c0_i32_1 = arith.constant 0 : i32
    return %c0_i32, %c0_i32_0 : i32, i32
  }
  func.func @transform_3(%arg0: i32, %arg1: i32) -> (i32, i32) {
    %c0_i32 = arith.constant 0 : i32
    %c0_i32_0 = arith.constant 0 : i32
    return %arg0, %c0_i32 : i32, i32
  }
}

</mosaic_0001>

<bundles_post_ra>
// kernel: tpu_custom_call.1
= control target key start
LH: loop header
LB: loop body
LE: loop exit
PB: predicated region body
PF: predicated region fallthrough
CT: control target
= control target key end

     0   :  { %8 = vsyncpa [#allocation4], 0  ;;  %s1450_s0 = inlined_call_operand.vmem [shape: f32[200,8], index: 0, kind: input, shape index: {}]   ;;  %s1451_s1 = inlined_call_operand.vmem [shape: s32[200,1], index: 1, kind: input, shape index: {}]   ;;  %s1452_s2 = inlined_call_operand.vmem [shape: f32[8,8], index: 2, kind: input, shape index: {}]   ;;  %s1453_s3 = inlined_call_operand.hbm [shape: f32[16,128], index: 3, kind: output, shape index: {}]  }
   0x1   :  { %10 = vsyncpa [#allocation4 + $0x1], 0  ;;  %s1161_s12 = smov 0   ;;  %s1163_s13 = smov 0  }
   0x2   :  { %s1165_s14 = smov 0   ;;  %s1167_s15 = smov 0  }
   0x3   :  { %s1169_s16 = smov 0   ;;  %s1171_s17 = smov 0  }
   0x4   :  { %s1173_s18 = smov 0   ;;  %s1175_s19 = smov 0  }
   0x5 LB: > { %s863_s20 = sadd.s32 4294967295, %s1135_s19   ;;  %s864_s21 = sadd.s32 4294967294, %s1135_s19   ;;  %s1135_s19 = sphi %s1175_s19, %s16_s19   ;;  %s1131_s18 = sphi %s1173_s18, %s1462_s18   ;;  %s1127_s17 = sphi %s1171_s17, %s1461_s17   ;;  %s1123_s16 = sphi %s1169_s16, %s1460_s16   ;;  %s1119_s15 = sphi %s1167_s15, %s1459_s15   ;;  %s1115_s14 = sphi %s1165_s14, %s1458_s14   ;;  %s1111_s13 = sphi %s1163_s13, %s1457_s13   ;;  %s1107_s12 = sphi %s1161_s12, %s1456_s12  }
   0x6   : > { %s25_s22 = sadd.s32 1, %s1127_s17  ;;  %s28_s23 = sadd.s32 1, %s1131_s18 }
   0x7   : > { %p26_p0 = scmp.ge.s32.totalorder %s25_s22, 2  ;;  %p134_p1 = scmp.ne.s32.totalorder %s1115_s14, %s1111_s13 }
   0x8   : > { %p135_p2 = scmp.eq.s32.totalorder %s863_s20, 3  ;;  %p140_p4 = scmp.ne.s32.totalorder %s1111_s13, %s1107_s12 }
   0x9   : > { %s1464_s22 = smov (%p26_p0, %s25_s22), 0  ;;  %s1466_s23 = smov (!%p26_p0, %s28_s23), %s1131_s18 }
   0xa   : > { %p1210_p3 = por %p135_p2, %p134_p1  ;;  %p30_p5 = scmp.ge.s32.totalorder %s1466_s23, 2 }
   0xb   : > { %p141_p6 = scmp.eq.s32.totalorder %s864_s21, 3  ;;  %p871_p7 = scmp.ge.s32.totalorder %s1135_s19, 1 }
   0xc   : > { %p212_p8 = scmp.lt.s32.totalorder %s1135_s19, 5  ;;  %s1468_s23 = smov (%p30_p5, %s1466_s23), 0 }
   0xd   : > { %p1220_p9 = por %p141_p6, %p140_p4  ;;  %s121_s26 = ssub.s32 %s1131_s18, %s1468_s23 }
   0xe   : > { %p213_p10 = pnand %p871_p7, %p212_p8  ;;  %s124_s27 = sadd.s32 1, %s1115_s14 }
   0xf   : > { %p122_p11 = scmp.eq.s32.totalorder %s121_s26, 0  ;;  %s254_s29 = sand.u32 (!%p213_p10), 1, %s1111_s13  }
  0x10   : > { %216 = sbr.rel (%p213_p10) target bundleno = 793 (0x319), region = 32  ;;  %s873_s30 = sshll.u32 (!%p213_p10), %s1123_s16, 1 }
  0x11   : > { %s1228_s28 = scalar_select %p122_p11, %s1115_s14, %s124_s27  }
  0x12   : > { %s1234_s4 = sshll.u32 (!%p213_p10), %s254_s29, 3  ;;  %s1237_s5 = sadd.s32 (!%p213_p10), %s1119_s15, %s873_s30 }
  0x13   : > { %p259_p12 = scmp.lt.s32.totalorder (!%p213_p10), %s1237_s5, 3  ;;  %s256_s27 = scalar_lea.vmem (!%p213_p10), [#allocation3], %s1234_s4 }
  0x14   : > { %p880_p0 = scmp.ne.s32.totalorder (!%p213_p10), %s1119_s15, 0 }
  0x15   : > { %s260_s6 = scalar_select %p259_p12, %s1237_s5, 3 }
  0x17   : > { %s874_s7 = sshll.u32 %s260_s6, 3 }
  0x18   : > { %p266_p13 = scmp.lt.s32.totalorder %s874_s7, 24  ;;  %306 = sbr.rel (%p880_p0) target bundleno = 34 (0x22), region = 36 }
  0x1a   : > { %s1470_s7 = smov (!%p266_p13, %s874_s7), 24 }
  0x1b   : > { %s875_s8 = sshll.u32 %s1470_s7, 3 }
  0x1c   : > { %s1244_s11 = scalar_lea.vmem %s1450_s0, %s875_s8  ;;  %s1249_s26 = scalar_lea.vmem %s1451_s1, %s875_s8 }
  0x1d   : > { %vm307_vm0 = vcmask 7168   ;;  %v1137_v0 = vmov 0.0  }
  0x1e   : > { %308 = vst.msk [vmem:[#allocation2] sm:$0xff] %vm307_vm0, %v1137_v0  ;;  %309 = vst.msk [vmem:[#allocation2 + $0x8] sm:$0xff] %vm307_vm0, %v1137_v0 }
  0x1f   : > { %310 = vst.msk [vmem:[#allocation2 + $0x10] sm:$0xff] %vm307_vm0, %v1137_v0  ;;  %311 = vst.msk [vmem:[#allocation2 + $0x18] sm:$0xff] %vm307_vm0, %v1137_v0 }
  0x20   : > { %312 = vst.msk [vmem:[#allocation2 + $0x20] sm:$0xff] %vm307_vm0, %v1137_v0  ;;  %313 = vst.msk [vmem:[#allocation2 + $0x28] sm:$0xff] %vm307_vm0, %v1137_v0 }
  0x21   : > { %314 = vst.msk [vmem:[#allocation2 + $0x30] sm:$0xff] %vm307_vm0, %v1137_v0  ;;  %315 = vst.msk [vmem:[#allocation2 + $0x38] sm:$0xff] %vm307_vm0, %v1137_v0 }
  0x22 PF: > { %v398_v1 = vld [vmem:[%s1249_s26 + $0x8] sm:$0xff]  ;;  %v397_v2 = vld [vmem:[%s1249_s26] sm:$0xff]  ;;  %v1138_v3 = vmov 0   ;;  %v403_v7 = vld [vmem:[%s1249_s26 + $0x30] sm:$0xff]  ;;  %vm324_vm1 = vcmask 64512   ;;  %v405_v27 = vlaneseq  ;;  %v1139_v31 = vmov 0.0  }
  0x23   : > { %1010 = vset.pattern.permute.xlu1 %v1138_v3  ;;  %1009 = vset.pattern.permute.xlu0 %v1138_v3  ;;  %v455_v4 = vld [vmem:[%s1452_s2] sm:$0xff]  ;;  %v402_v5 = vld [vmem:[%s1249_s26 + $0x28] sm:$0xff]  ;;  %v399_v8 = vld [vmem:[%s1249_s26 + $0x10] sm:$0xff]  ;;  %s906_s7 = sshll.u32 %s1237_s5, 6 }
  0x24   : > { %411 = vperm.xlu1 %1010, %v398_v1   ;;  %408 = vperm.xlu0 %1009, %v397_v2   ;;  %v401_v6 = vld [vmem:[%s1249_s26 + $0x20] sm:$0xff]  ;;  %v404_v9 = vld [vmem:[%s1249_s26 + $0x38] sm:$0xff]  ;;  %v1267_v13 = vld [vmem:[%s1244_s11 + $0x10] sm:$0xff]  ;;  %v406_v28 = vand.u32 127, %v405_v27  ;;  %s1336_s8 = sadd.s32 64, %s906_s7 }
  0x25   : > { %917 = vmatprep.subr.mxu0 %v455_v4  ;;  %931 = vmatprep.subr.mxu1 %v455_v4  ;;  %v400_v10 = vld [vmem:[%s1249_s26 + $0x18] sm:$0xff]  ;;  %v316_v11 = vld [vmem:[%s1244_s11] sm:$0xff]  ;;  %v1270_v14 = vld [vmem:[%s1244_s11 + $0x8] sm:$0xff]  ;;  %v331_v15 = vsel %vm324_vm1, %v1267_v13, -inf  ;;  %p898_p1 = scmp.gt.s32.totalorder %s1336_s8, 200 }
  0x26   : > { %918 = vmatpush3.msra.mxu0 %v455_v4  ;;  %932 = vmatpush3.msra.mxu1 %v455_v4  ;;  %v325_v12 = vsel %vm324_vm1, %v316_v11, -inf  ;;  %v328_v16 = vsel %vm324_vm1, %v1270_v14, -inf  ;;  %v1277_v17 = vld [vmem:[%s1244_s11 + $0x18] sm:$0xff]  ;;  %v1280_v18 = vld [vmem:[%s1244_s11 + $0x20] sm:$0xff]  ;;  %v1285_v20 = vld [vmem:[%s1244_s11 + $0x28] sm:$0xff] }
  0x27   : > { %v334_v19 = vsel %vm324_vm1, %v1277_v17, -inf  ;;  %v337_v21 = vsel %vm324_vm1, %v1280_v18, -inf  ;;  %v1290_v22 = vld [vmem:[%s1244_s11 + $0x30] sm:$0xff]  ;;  %v340_v23 = vsel %vm324_vm1, %v1285_v20, -inf  ;;  %v1295_v24 = vld [vmem:[%s1244_s11 + $0x38] sm:$0xff] }
  0x28   : > { %423 = vperm.xlu1 %1010, %v402_v5   ;;  %420 = vperm.xlu0 %1009, %v401_v6   ;;  %v343_v25 = vsel %vm324_vm1, %v1290_v22, -inf  ;;  %v346_v26 = vsel %vm324_vm1, %v1295_v24, -inf }
  0x2c   : > { %426 = vperm.xlu1 %1010, %v403_v7   ;;  %414 = vperm.xlu0 %1009, %v399_v8  }
  0x30   : > { %429 = vperm.xlu1 %1010, %v404_v9   ;;  %417 = vperm.xlu0 %1009, %v400_v10  }
  0x4f   : > { %326 = vmax.xlane.f32.xlu0 %v325_v12 }
  0x53   : > { %332 = vmax.xlane.f32.xlu0 %v331_v15 }
  0x54   : > { %329 = vmax.xlane.f32.xlu1 %v328_v16 }
  0x57   : > { %335 = vmax.xlane.f32.xlu0 %v334_v19 }
  0x58   : > { %338 = vmax.xlane.f32.xlu1 %v337_v21 }
  0x5b   : > { %341 = vmax.xlane.f32.xlu0 %v340_v23 }
  0x5c   : > { %344 = vmax.xlane.f32.xlu1 %v343_v25 }
  0x5f   : > { %347 = vmax.xlane.f32.xlu0 %v346_v26 }
  0x9f   : > { %v412_v29 = vpop.permute.xlu1 %411  ;;  %v409_v30 = vpop.permute.xlu0 %408 }
  0xa0   : > { %vm432_vm2 = vcmp.eq.s32.totalorder %v406_v28, %v412_v29  ;;  %vm431_vm3 = vcmp.eq.s32.totalorder %v406_v28, %v409_v30 }
  0xa1   : > { %v882_v32 = vsel %vm432_vm2, 1.0, %v1139_v31  ;;  %v881_v33 = vsel %vm431_vm3, 1.0, %v1139_v31 }
  0xa2   : > { %919 = vmatprep.mubr.msk.f32.mxu0 %vm324_vm1, %v881_v33 }
  0xa3   : > { %v424_v34 = vpop.permute.xlu1 %423  ;;  %v421_v35 = vpop.permute.xlu0 %420  ;;  %920 = vmatmul.mubr.msk.f32.vlgmr.msra.gmra.mxu0 %vm324_vm1, %v882_v32 }
  0xa4   : > { %vm436_vm4 = vcmp.eq.s32.totalorder %v406_v28, %v424_v34  ;;  %vm435_vm5 = vcmp.eq.s32.totalorder %v406_v28, %v421_v35 }
  0xa5   : > { %v886_v36 = vsel %vm436_vm4, 1.0, %v1139_v31  ;;  %v885_v37 = vsel %vm435_vm5, 1.0, %v1139_v31 }
  0xa6   : > { %925 = vmatprep.mubr.msk.f32.mxu1 %vm324_vm1, %v885_v37 }
  0xa7   : > { %v427_v38 = vpop.permute.xlu1 %426  ;;  %v415_v39 = vpop.permute.xlu0 %414  ;;  %926 = vmatmul.mubr.msk.f32.vlgmr.msra.gmra.mxu1 %vm324_vm1, %v886_v36 }
  0xa8   : > { %vm437_vm6 = vcmp.eq.s32.totalorder %v406_v28, %v427_v38  ;;  %vm433_vm7 = vcmp.eq.s32.totalorder %v406_v28, %v415_v39 }
  0xa9   : > { %v887_v40 = vsel %vm437_vm6, 1.0, %v1139_v31  ;;  %v883_v41 = vsel %vm433_vm7, 1.0, %v1139_v31 }
  0xaa   : > { %922 = vmatprep.mubr.msk.f32.mxu0 %vm324_vm1, %v883_v41  ;;  %928 = vmatprep.mubr.msk.f32.mxu1 %vm324_vm1, %v887_v40 }
  0xab   : > { %v430_v42 = vpop.permute.xlu1 %429  ;;  %v418_v43 = vpop.permute.xlu0 %417 }
  0xac   : > { %vm438_vm8 = vcmp.eq.s32.totalorder %v406_v28, %v430_v42  ;;  %vm434_vm9 = vcmp.eq.s32.totalorder %v406_v28, %v418_v43 }
  0xad   : > { %v888_v44 = vsel %vm438_vm8, 1.0, %v1139_v31  ;;  %v884_v45 = vsel %vm434_vm9, 1.0, %v1139_v31 }
  0xae   : > { %923 = vmatmul.mubr.msk.f32.gmra.mxu0 %vm324_vm1, %v884_v45  ;;  %929 = vmatmul.mubr.msk.f32.gmra.mxu1 %vm324_vm1, %v888_v44 }
  0xd8   : > { %v327_v46 = vpop.xlane.xlu0 %326 }
  0xd9   : > { %v349_v47 = vsub.f32 %v316_v11, %v327_v46 }
  0xdb   : > { %v357_v48 = vmul.f32 1.442695, %v349_v47 }
  0xdc   : > { %v333_v49 = vpop.xlane.xlu0 %332 }
  0xdd   : > { %1011 = vpow2.f32 %v357_v48  ;;  %v330_v50 = vpop.xlane.xlu1 %329  ;;  %v351_v51 = vsub.f32 %v1267_v13, %v333_v49 }
  0xde   : > { %v350_v52 = vsub.f32 %v1270_v14, %v330_v50 }
  0xdf   : > { %v361_v53 = vmul.f32 1.442695, %v351_v51 }
  0xe0   : > { %v359_v54 = vmul.f32 1.442695, %v350_v52  ;;  %v336_v55 = vpop.xlane.xlu0 %335 }
  0xe1   : > { %1013 = vpow2.f32 %v361_v53  ;;  %v352_v56 = vsub.f32 %v1277_v17, %v336_v55  ;;  %v339_v57 = vpop.xlane.xlu1 %338 }
  0xe2   : > { %1015 = vpow2.f32 %v359_v54  ;;  %v353_v58 = vsub.f32 %v1280_v18, %v339_v57 }
  0xe3   : > { %v363_v59 = vmul.f32 1.442695, %v352_v56 }
  0xe4   : > { %v342_v60 = vpop.xlane.xlu0 %341  ;;  %v365_v61 = vmul.f32 1.442695, %v353_v58 }
  0xe5   : > { %1017 = vpow2.f32 %v363_v59  ;;  %v354_v62 = vsub.f32 %v1285_v20, %v342_v60  ;;  %v345_v63 = vpop.xlane.xlu1 %344 }
  0xe6   : > { %1019 = vpow2.f32 %v365_v61  ;;  %v355_v0 = vsub.f32 %v1290_v22, %v345_v63 }
  0xe7   : > { %v367_v1 = vmul.f32 1.442695, %v354_v62 }
  0xe8   : > { %v348_v2 = vpop.xlane.xlu0 %347  ;;  %v369_v3 = vmul.f32 1.442695, %v355_v0 }
  0xe9   : > { %1021 = vpow2.f32 %v367_v1  ;;  %v356_v4 = vsub.f32 %v1295_v24, %v348_v2 }
  0xea   : > { %v1012_v5 = vpop.eup %1011  ;;  %1023 = vpow2.f32 %v369_v3 }
  0xeb   : > { %v371_v6 = vmul.f32 1.442695, %v356_v4  ;;  %v373_v7 = vsel %vm324_vm1, %v1012_v5, 0.0 }
  0xec   : > { %374 = vadd.xlane.f32.xlu1 %v373_v7 }
  0xed   : > { %1025 = vpow2.f32 %v371_v6 }
  0xee   : > { %v1014_v8 = vpop.eup %1013 }
  0xef   : > { %v1016_v9 = vpop.eup %1015  ;;  %v379_v10 = vsel %vm324_vm1, %v1014_v8, 0.0 }
  0xf0   : > { %v376_v11 = vsel %vm324_vm1, %v1016_v9, 0.0  ;;  %380 = vadd.xlane.f32.xlu1 %v379_v10 }
  0xf1   : > { %377 = vadd.xlane.f32.xlu0 %v376_v11 }
  0xf2   : > { %v1018_v12 = vpop.eup %1017 }
  0xf3   : > { %v1020_v13 = vpop.eup %1019  ;;  %v382_v14 = vsel %vm324_vm1, %v1018_v12, 0.0 }
  0xf4   : > { %v385_v15 = vsel %vm324_vm1, %v1020_v13, 0.0 }
  0xf5   : > { %383 = vadd.xlane.f32.xlu0 %v382_v14  ;;  %386 = vadd.xlane.f32.xlu1 %v385_v15 }
  0xf6   : > { %v1022_v16 = vpop.eup %1021 }
  0xf7   : > { %v1024_v17 = vpop.eup %1023  ;;  %v388_v18 = vsel %vm324_vm1, %v1022_v16, 0.0 }
  0xf8   : > { %v391_v19 = vsel %vm324_vm1, %v1024_v17, 0.0 }
  0xf9   : > { %389 = vadd.xlane.f32.xlu0 %v388_v18  ;;  %392 = vadd.xlane.f32.xlu1 %v391_v19 }
  0xfa   : > { %v1026_v20 = vpop.eup %1025 }
  0xfb   : > { %v394_v21 = vsel %vm324_vm1, %v1026_v20, 0.0 }
  0xfd   : > { %395 = vadd.xlane.f32.xlu0 %v394_v21 }
 0x163   : > { %v921_v22 = vpop.f32.mrf.mxu0 }
 0x164   : > { %v586_v23 = vmul.f32 %v1016_v9, %v921_v22 }
 0x165   : > { %v546_v24 = vpop.f32.mrf.mxu0 }
 0x166   : > { %v585_v25 = vmul.f32 %v1012_v5, %v546_v24  ;;  %v596_v26 = vsel %vm324_vm1, %v586_v23, 0.0 }
 0x167   : > { %v927_v28 = vpop.f32.mrf.mxu1  ;;  %597 = vadd.xlane.f32.xlu0 %v596_v26 }
 0x168   : > { %v590_v29 = vmul.f32 %v1022_v16, %v927_v28  ;;  %v593_v30 = vsel %vm324_vm1, %v585_v25, 0.0 }
 0x169   : > { %v566_v31 = vpop.f32.mrf.mxu1  ;;  %594 = vadd.xlane.f32.xlu1 %v593_v30 }
 0x16a   : > { %v589_v32 = vmul.f32 %v1020_v13, %v566_v31  ;;  %v608_v33 = vsel %vm324_vm1, %v590_v29, 0.0 }
 0x16b   : > { %609 = vadd.xlane.f32.xlu0 %v608_v33 }
 0x16c   : > { %v605_v34 = vsel %vm324_vm1, %v589_v32, 0.0 }
 0x16d   : > { %606 = vadd.xlane.f32.xlu1 %v605_v34 }
 0x16e   : > { %v924_v35 = vpop.f32.mrf.mxu0  ;;  %v930_v36 = vpop.f32.mrf.mxu1 }
 0x16f   : > { %v588_v37 = vmul.f32 %v1018_v12, %v924_v35  ;;  %v592_v40 = vmul.f32 %v1026_v20, %v930_v36 }
 0x170   : > { %v556_v38 = vpop.f32.mrf.mxu0  ;;  %v576_v39 = vpop.f32.mrf.mxu1 }
 0x171   : > { %v587_v41 = vmul.f32 %v1014_v8, %v556_v38  ;;  %v602_v42 = vsel %vm324_vm1, %v588_v37, 0.0  ;;  %v591_v43 = vmul.f32 %v1024_v17, %v576_v39  ;;  %v614_v45 = vsel %vm324_vm1, %v592_v40, 0.0 }
 0x172   : > { %603 = vadd.xlane.f32.xlu0 %v602_v42 }
 0x173   : > { %v599_v44 = vsel %vm324_vm1, %v587_v41, 0.0  ;;  %v611_v46 = vsel %vm324_vm1, %v591_v43, 0.0 }
 0x174   : > { %600 = vadd.xlane.f32.xlu1 %v599_v44 }
 0x175   : > { %v375_v48 = vpop.xlane.xlu1 %374 }
 0x176   : > { %615 = vadd.xlane.f32.xlu0 %v614_v45 }
 0x178   : > { %612 = vadd.xlane.f32.xlu1 %v611_v46 }
 0x179   : > { %v381_v50 = vpop.xlane.xlu1 %380 }
 0x17a   : > { %v378_v47 = vpop.xlane.xlu0 %377 }
 0x17b   : > { %1027 = vrcp.f32 %v378_v47 }
 0x17c   : > { %1029 = vrcp.f32 %v375_v48 }
 0x17e   : > { %v384_v49 = vpop.xlane.xlu0 %383  ;;  %v387_v52 = vpop.xlane.xlu1 %386 }
 0x182   : > { %v390_v51 = vpop.xlane.xlu0 %389  ;;  %v393_v54 = vpop.xlane.xlu1 %392 }
 0x183   : > { %1031 = vrcp.f32 %v390_v51 }
 0x184   : > { %1033 = vrcp.f32 %v387_v52 }
 0x185   : > { %1035 = vrcp.f32 %v384_v49 }
 0x186   : > { %v396_v53 = vpop.xlane.xlu0 %395  ;;  %1037 = vrcp.f32 %v381_v50 }
 0x187   : > { %1039 = vrcp.f32 %v396_v53 }
 0x188   : > { %v1028_v55 = vpop.eup %1027  ;;  %1041 = vrcp.f32 %v393_v54 }
 0x189   : > { %v1030_v57 = vpop.eup %1029 }
 0x190   : > { %v1032_v59 = vpop.eup %1031 }
 0x191   : > { %v1034_v62 = vpop.eup %1033 }
 0x192   : > { %v1036_v3 = vpop.eup %1035 }
 0x193   : > { %v1038_v5 = vpop.eup %1037 }
 0x194   : > { %v1040_v7 = vpop.eup %1039 }
 0x195   : > { %v1042_v12 = vpop.eup %1041 }
 0x1f0   : > { %v598_v56 = vpop.xlane.xlu0 %597 }
 0x1f1   : > { %v1338_v58 = vmul.f32 %v1028_v55, %v598_v56 }
 0x1f2   : > { %v595_v60 = vpop.xlane.xlu1 %594 }
 0x1f3   : > { %v1340_v61 = vmul.f32 %v1030_v57, %v595_v60 }
 0x1f4   : > { %v610_v63 = vpop.xlane.xlu0 %609 }
 0x1f5   : > { %v1342_v0 = vmul.f32 %v1032_v59, %v610_v63 }
 0x1f6   : > { %v607_v1 = vpop.xlane.xlu1 %606 }
 0x1f7   : > { %v1344_v2 = vmul.f32 %v1034_v62, %v607_v1 }
 0x1fb   : > { %v604_v4 = vpop.xlane.xlu0 %603 }
 0x1fc   : > { %v1346_v6 = vmul.f32 %v1036_v3, %v604_v4 }
 0x1fd   : > { %v601_v8 = vpop.xlane.xlu1 %600 }
 0x1fe   : > { %v1348_v9 = vmul.f32 %v1038_v5, %v601_v8  ;;  %638 = sbr.rel (%p898_p1) target bundleno = 522 (0x20a), region = 40 }
 0x1ff   : > { %v616_v10 = vpop.xlane.xlu0 %615 }
 0x200   : > { %v1350_v11 = vmul.f32 %v1040_v7, %v616_v10 }
 0x201   : > { %v613_v13 = vpop.xlane.xlu1 %612 }
 0x202   : > { %v1352_v14 = vmul.f32 %v1042_v12, %v613_v13 }
 0x203   : > { %v639_v15 = vld [vmem:[#allocation2] sm:$0xff]  ;;  %vm655_vm10 = vcmask 7168   ;;  %v640_v16 = vld [vmem:[#allocation2 + $0x8] sm:$0xff]  ;;  %v641_v17 = vld [vmem:[#allocation2 + $0x10] sm:$0xff] }
 0x204   : > { %v647_v18 = vadd.f32 %v639_v15, %v1340_v61  ;;  %v648_v19 = vadd.f32 %v640_v16, %v1338_v58  ;;  %v649_v20 = vadd.f32 %v641_v17, %v1348_v9  ;;  %v642_v21 = vld [vmem:[#allocation2 + $0x18] sm:$0xff]  ;;  %v643_v22 = vld [vmem:[#allocation2 + $0x20] sm:$0xff]  ;;  %v644_v23 = vld [vmem:[#allocation2 + $0x28] sm:$0xff] }
 0x205   : > { %v650_v24 = vadd.f32 %v642_v21, %v1346_v6  ;;  %v651_v25 = vadd.f32 %v643_v22, %v1344_v2  ;;  %v652_v26 = vadd.f32 %v644_v23, %v1342_v0  ;;  %v645_v28 = vld [vmem:[#allocation2 + $0x30] sm:$0xff]  ;;  %v646_v29 = vld [vmem:[#allocation2 + $0x38] sm:$0xff] }
 0x206   : > { %656 = vst.msk [vmem:[#allocation2] sm:$0xff] %vm655_vm10, %v647_v18  ;;  %657 = vst.msk [vmem:[#allocation2 + $0x8] sm:$0xff] %vm655_vm10, %v648_v19  ;;  %v653_v30 = vadd.f32 %v645_v28, %v1352_v14  ;;  %v654_v31 = vadd.f32 %v646_v29, %v1350_v11 }
 0x207   : > { %658 = vst.msk [vmem:[#allocation2 + $0x10] sm:$0xff] %vm655_vm10, %v649_v20  ;;  %659 = vst.msk [vmem:[#allocation2 + $0x18] sm:$0xff] %vm655_vm10, %v650_v24 }
 0x208   : > { %660 = vst.msk [vmem:[#allocation2 + $0x20] sm:$0xff] %vm655_vm10, %v651_v25  ;;  %661 = vst.msk [vmem:[#allocation2 + $0x28] sm:$0xff] %vm655_vm10, %v652_v26 }
 0x209   : > { %662 = vst.msk [vmem:[#allocation2 + $0x30] sm:$0xff] %vm655_vm10, %v653_v30  ;;  %663 = vst.msk [vmem:[#allocation2 + $0x38] sm:$0xff] %vm655_vm10, %v654_v31 }
 0x20a PF: > { %p899_p2 = scmp.le.s32.totalorder %s1336_s8, 200 }
 0x20c   : > { %667 = sbr.rel (%p899_p2) target bundleno = 545 (0x221), region = 44 }
 0x211   : > { %v669_v32 = vshrl.u32 %v405_v27, 7  ;;  %v678_v33 = vstv %s906_s7  ;;  %vm719_vm11 = vcmask 7168   ;;  %v687_v38 = vld [vmem:[#allocation2] sm:$0xff]  ;;  %v688_v47 = vld [vmem:[#allocation2 + $0x8] sm:$0xff]  ;;  %v689_v27 = vld [vmem:[#allocation2 + $0x10] sm:$0xff] }
 0x212   : > { %v690_v48 = vld [vmem:[#allocation2 + $0x18] sm:$0xff]  ;;  %v691_v53 = vld [vmem:[#allocation2 + $0x20] sm:$0xff]  ;;  %v692_v62 = vld [vmem:[#allocation2 + $0x28] sm:$0xff] }
 0x213   : > { %v679_v34 = vadd.s32 %v678_v33, %v669_v32  ;;  %v670_v35 = vadd.s32 8, %v669_v32  ;;  %v671_v36 = vadd.s32 16, %v669_v32  ;;  %v672_v37 = vadd.s32 24, %v669_v32  ;;  %v693_v63 = vld [vmem:[#allocation2 + $0x30] sm:$0xff]  ;;  %v694_v5 = vld [vmem:[#allocation2 + $0x38] sm:$0xff] }
 0x214   : > { %v673_v39 = vadd.s32 32, %v669_v32  ;;  %v674_v40 = vadd.s32 40, %v669_v32  ;;  %v675_v41 = vadd.s32 48, %v669_v32  ;;  %v676_v42 = vadd.s32 56, %v669_v32 }
 0x215   : > { %vm695_vm12 = vcmp.lt.s32.totalorder %v679_v34, 200  ;;  %v680_v43 = vadd.s32 %v678_v33, %v670_v35  ;;  %v681_v44 = vadd.s32 %v678_v33, %v671_v36  ;;  %v682_v45 = vadd.s32 %v678_v33, %v672_v37 }
 0x216   : > { %v703_v46 = vsel %vm695_vm12, %v1340_v61, 0.0  ;;  %v683_v49 = vadd.s32 %v678_v33, %v673_v39  ;;  %v684_v50 = vadd.s32 %v678_v33, %v674_v40  ;;  %v685_v51 = vadd.s32 %v678_v33, %v675_v41 }
 0x217   : > { %v711_v52 = vadd.f32 %v703_v46, %v687_v38  ;;  %vm696_vm13 = vcmp.lt.s32.totalorder %v680_v43, 200  ;;  %vm697_vm14 = vcmp.lt.s32.totalorder %v681_v44, 200  ;;  %vm698_vm15 = vcmp.lt.s32.totalorder %v682_v45, 200 }
 0x218   : > { %v704_v54 = vsel %vm696_vm13, %v1338_v58, 0.0  ;;  %v705_v55 = vsel %vm697_vm14, %v1348_v9, 0.0  ;;  %v706_v56 = vsel %vm698_vm15, %v1346_v6, 0.0  ;;  %vm699_vm0 = vcmp.lt.s32.totalorder %v683_v49, 200 }
 0x219   : > { %720 = vst.msk [vmem:[#allocation2] sm:$0xff] %vm719_vm11, %v711_v52  ;;  %v712_v57 = vadd.f32 %v704_v54, %v688_v47  ;;  %v713_v59 = vadd.f32 %v705_v55, %v689_v27  ;;  %v714_v60 = vadd.f32 %v706_v56, %v690_v48  ;;  %v707_v61 = vsel %vm699_vm0, %v1344_v2, 0.0 }
 0x21a   : > { %v715_v1 = vadd.f32 %v707_v61, %v691_v53  ;;  %vm700_vm1 = vcmp.lt.s32.totalorder %v684_v50, 200  ;;  %vm701_vm2 = vcmp.lt.s32.totalorder %v685_v51, 200  ;;  %v686_v3 = vadd.s32 %v678_v33, %v676_v42 }
 0x21b   : > { %721 = vst.msk [vmem:[#allocation2 + $0x8] sm:$0xff] %vm719_vm11, %v712_v57  ;;  %722 = vst.msk [vmem:[#allocation2 + $0x10] sm:$0xff] %vm719_vm11, %v713_v59  ;;  %v708_v58 = vsel %vm700_vm1, %v1342_v0, 0.0  ;;  %v709_v4 = vsel %vm701_vm2, %v1352_v14, 0.0 }
 0x21c   : > { %723 = vst.msk [vmem:[#allocation2 + $0x18] sm:$0xff] %vm719_vm11, %v714_v60  ;;  %724 = vst.msk [vmem:[#allocation2 + $0x20] sm:$0xff] %vm719_vm11, %v715_v1  ;;  %v716_v2 = vadd.f32 %v708_v58, %v692_v62  ;;  %v717_v6 = vadd.f32 %v709_v4, %v693_v63  ;;  %vm702_vm3 = vcmp.lt.s32.totalorder %v686_v3, 200 }
 0x21d   : > { %v710_v7 = vsel %vm702_vm3, %v1350_v11, 0.0 }
 0x21e   : > { %725 = vst.msk [vmem:[#allocation2 + $0x28] sm:$0xff] %vm719_vm11, %v716_v2  ;;  %726 = vst.msk [vmem:[#allocation2 + $0x30] sm:$0xff] %vm719_vm11, %v717_v6  ;;  %v718_v8 = vadd.f32 %v710_v7, %v694_v5 }
 0x220   : > { %727 = vst.msk [vmem:[#allocation2 + $0x38] sm:$0xff] %vm719_vm11, %v718_v8 }
 0x221 PF: > { %p901_p4 = scmp.ne.s32.totalorder %s1119_s15, 1 }
 0x223   : > { %731 = sbr.rel (%p901_p4) target bundleno = 770 (0x302), region = 48 }
 0x228   : > { %v732_v0 = vld [vmem:[#allocation2] sm:$0xff]  ;;  %v733_v9 = vld [vmem:[#allocation2 + $0x8] sm:$0xff]  ;;  %v734_v10 = vld [vmem:[#allocation2 + $0x10] sm:$0xff]  ;;  %vm740_vm4 = vcmask 7168  }
 0x229   : > { %v735_v12 = vld [vmem:[#allocation2 + $0x18] sm:$0xff]  ;;  %v741_v13 = vsel %vm740_vm4, %v732_v0, 0.0  ;;  %v742_v11 = vsel %vm740_vm4, %v733_v9, 0.0  ;;  %v744_v14 = vsel %vm740_vm4, %v734_v10, 0.0  ;;  %v736_v15 = vld [vmem:[#allocation2 + $0x20] sm:$0xff]  ;;  %v737_v18 = vld [vmem:[#allocation2 + $0x28] sm:$0xff] }
 0x22a   : > { %v743_v16 = vadd.f32 %v742_v11, %v741_v13  ;;  %v746_v17 = vsel %vm740_vm4, %v735_v12, 0.0  ;;  %v748_v20 = vsel %vm740_vm4, %v736_v15, 0.0  ;;  %v738_v21 = vld [vmem:[#allocation2 + $0x30] sm:$0xff]  ;;  %v750_v23 = vsel %vm740_vm4, %v737_v18, 0.0  ;;  %v739_v24 = vld [vmem:[#allocation2 + $0x38] sm:$0xff] }
 0x22b   : > { %v752_v26 = vsel %vm740_vm4, %v738_v21, 0.0  ;;  %v754_v29 = vsel %vm740_vm4, %v739_v24, 0.0 }
 0x22c   : > { %v745_v19 = vadd.f32 %v744_v14, %v743_v16 }
 0x22e   : > { %v747_v22 = vadd.f32 %v746_v17, %v745_v19 }
 0x230   : > { %v749_v25 = vadd.f32 %v748_v20, %v747_v22 }
 0x232   : > { %v751_v28 = vadd.f32 %v750_v23, %v749_v25 }
 0x234   : > { %v753_v30 = vadd.f32 %v752_v26, %v751_v28 }
 0x236   : > { %v755_v31 = vadd.f32 %v754_v29, %v753_v30 }
 0x238   : > { %756 = vadd.xlane.f32.xlu0 %v755_v31 }
 0x2c1   : > { %v757_v32 = vpop.xlane.xlu0 %756 }
 0x2c2   : > { %v758_v33 = vrot.slane %v757_v32, 4 }
 0x2c4   : > { %v759_v34 = vadd.f32 %v758_v33, %v757_v32 }
 0x2c6   : > { %v760_v35 = vrot.slane %v759_v34, 2 }
 0x2c8   : > { %v761_v36 = vadd.f32 %v760_v35, %v759_v34 }
 0x2ca   : > { %v762_v37 = vrot.slane %v761_v36, 1 }
 0x2cc   : > { %v763_v38 = vadd.f32 %v762_v37, %v761_v36 }
 0x2ce   : > { %933 = vpush %v763_v38 }
 0x2ff   : > { %s934_s15 = spop %933 }
 0x300   : > { %v765_v39 = vstv %s934_s15 }
 0x301   : > { %766 = vst [vmem:[%s256_s27] sm:$0xff] %v765_v39 }
 0x302 PF: > { %s903_s5 = sshll.u32 %s1123_s16, 7  ;;  %s781_s20 = sshll.u32 %s256_s27, 4  ;;  %s782_s20 = int_to_ptr.vmem [resolvable:$true] %s781_s20 }
 0x303   : > { %s779_s11 = scalar_lea.hbm %s1453_s3, %s903_s5  ;;  %s768_s21 = scalar_lea.sflag [#allocation4], %s254_s29 }
 0x304   : > { %s1043_s26 = scalar_lea.vmem %s782_s20, 128  ;;  %s1140_s30 = smov [#allocation3]  }
 0x305   : > { %p1044_p5 = scmp.ne.s32.totalorder %s782_s20, %s1043_s26  ;;  %s1047_s6 = sshll.u32 %s1140_s30, 4  ;;  %s1048_s6 = int_to_ptr.vmem [resolvable:$false] %s1047_s6 }
 0x306   : > { %s1049_s7 = scalar_lea.vmem %s1048_s6, 256  ;;  %p1050_p8 = scmp.lt.s32.totalorder %s782_s20, %s1048_s6 }
 0x307   : > { %p1045_p6 = pnand %p1044_p5, %p1210_p3  ;;  %p1051_p10 = scmp.lt.s32.totalorder %s1049_s7, %s1043_s26 }
 0x309   : > { %p1046_p7 = pneg %p1045_p6  ;;  %p1052_p11 = por %p1051_p10, %p1050_p8 }
 0x30b   : > { %p1053_p12 = pnand %p1052_p11, %p1046_p7 }
 0x30d   : > { %1056 = shalt.err (!%p1053_p12)
}
 0x30e   : > { %s1057_s16 = scalar_lea.hbm %s779_s11, 128  ;;  %s1061_s27 = scalar_lea.hbm %s1453_s3, 256 }
 0x30f   : > { %p1058_p13 = scmp.ne.s32.totalorder %s779_s11, %s1057_s16  ;;  %p1062_p2 = scmp.lt.s32.totalorder %s779_s11, %s1453_s3 }
 0x310   : > { %p1063_p4 = scmp.lt.s32.totalorder %s1061_s27, %s1057_s16 }
 0x311   : > { %p1059_p0 = pnand %p1058_p13, %p1210_p3 }
 0x312   : > { %p1064_p5 = por %p1063_p4, %p1062_p2 }
 0x313   : > { %p1060_p1 = pneg %p1059_p0 }
 0x315   : > { %p1065_p6 = pnand %p1064_p5, %p1060_p1 }
 0x317   : > { %1068 = shalt.err (!%p1065_p6)
}
 0x318   : > { %935 = dma.vmem_to_hbm [thread:$0]  (%p1210_p3), %s782_s20, 128, %s779_s11, %s768_s21  }
 0x319 PF: > { %p941_p7 = scmp.ge.s32.totalorder %s1135_s19, 2  ;;  %s793_s5 = sand.u32 1, %s1107_s12  }
 0x31a   : > { %s794_s9 = scalar_lea.sflag [#allocation4], %s793_s5 }
 0x31b   : > { %p938_p8 = pnand %p941_p7, %p1220_p9 }
 0x31d   : > { %p939_p10 = pneg %p938_p8 }
 0x31f   : > { %1102 = dma.done.wait (%p939_p10), %s794_s9, 128  }
 0x320   : > { %1104 = vsyncadd (%p939_p10), %s794_s9, 4294967168  ;;  %s16_s19 = sadd.s32 1, %s1135_s19   ;;  %s1456_s12 = smov %s1111_s13 }
 0x321   : > { %p13_p11 = scmp.ge.s32.totalorder %s16_s19, 6   ;;  %s1457_s13 = smov %s1115_s14 }
 0x322   : > { %s1458_s14 = smov %s1228_s28  ;;  %s1459_s15 = smov %s1127_s17 }
 0x323   : > { %s1460_s16 = smov %s1131_s18  ;;  %s1461_s17 = smov %s1464_s22 }
 0x324   : > { %s1462_s18 = smov %s1468_s23  ;;  %15 = sbr.rel (!%p13_p11) target bundleno = 5 (0x5), region = 86 }
 0x329   :  { %799 = vsyncpa [#allocation4], 1 }
 0x32a   :  { %801 = vsyncpa [#allocation4 + $0x1], 1 }

</bundles_post_ra>
